<compile_context>
chip_gen: v7x
topology: tpu7x:2x2x1
jax: 0.10.0
libtpu: 0.0.40
codegen_flags: <defaults>
</compile_context>

<pallas_src>
import jax
import jax.numpy as jnp
from jax import lax
from jax.experimental import pallas as pl
from jax.experimental.pallas import tpu as pltpu


def _sigmoid(z):
    # sigmoid(z) == 0.5 * tanh(0.5 * z) + 0.5 : one EUP transcendental per
    # element instead of exp + reciprocal (only one EUP slot per bundle).
    return 0.5 * jnp.tanh(0.5 * z) + 0.5


def pnn_kernel_small(x_ref, w1_ref, b1_ref, w2_ref, b2_ref, y_ref):
    """Gridless small-batch path, natural (batch, feature) layout.

    x:(B,J)  w1:(H,J)  b1:(1,H)  w2:(K,H)  b2:(1,K)  y:(B,K)   (all VMEM)
    PyTorch (out, in) weight layout; the transpose is folded into dot_general.
    """
    x = x_ref[...].astype(jnp.float32)
    h = lax.dot_general(
        x, w1_ref[...].astype(jnp.float32),
        dimension_numbers=(((1,), (1,)), ((), ())),
        preferred_element_type=jnp.float32)
    h = jnp.maximum(h + b1_ref[...], 0.0)                    # bias + ReLU on VPU
    z = lax.dot_general(
        h, w2_ref[...].astype(jnp.float32),
        dimension_numbers=(((1,), (1,)), ((), ())),
        preferred_element_type=jnp.float32)
    y_ref[...] = _sigmoid(z + b2_ref[...]).astype(y_ref.dtype)


def pnn_kernel_lanedense(xt_ref, w1_ref, b1_ref, w2_ref, b2_ref, yt_ref):
    """Large-batch path: batch on the lane (last) axis -> lane-dense loads/stores.

    xt:(J,Bt)  w1:(H,J)  b1:(H,1)  w2:(K,H)  b2:(K,1)  yt:(K,Bt)
    h = W1 @ xT (H,Bt); z = W2 @ h (K,Bt).  Tiny M keeps MXU push count low.
    """
    xt = xt_ref[...].astype(jnp.float32)
    h = lax.dot_general(
        w1_ref[...].astype(jnp.float32), xt,
        dimension_numbers=(((1,), (0,)), ((), ())),
        preferred_element_type=jnp.float32)
    h = jnp.maximum(h + b1_ref[...], 0.0)                    # (H,1) lane-broadcast
    z = lax.dot_general(
        w2_ref[...].astype(jnp.float32), h,
        dimension_numbers=(((1,), (0,)), ((), ())),
        preferred_element_type=jnp.float32)
    yt_ref[...] = _sigmoid(z + b2_ref[...]).astype(yt_ref.dtype)


# Routing / tiling knobs (shapes are static under jit, so this is trace-time).
_SMALL_B = 2048       # up to here: gridless whole-in-VMEM path (typical PNN batch)
_TILE_B_MAX = 8192    # lane-dense batch tile cap; double-buffered blocks ~1.6 MiB
                      # total -> safe on v7x (32 MiB scoped / 64 MiB physical)


def _pick_tile(b):
    # Lane tile is a power of two >= 512 (multiple of 128 lanes), aims for at
    # least 2 grid steps so the "parallel" axis can split across v7x's 2 TCs.
    return min(_TILE_B_MAX, max(512, pl.next_power_of_2(pl.cdiv(b, 2))))


@jax.jit
def pnn_forward(x, w1, b1, w2, b2):
    """x: (B, J). w1: (H, J), b1: (H,), w2: (K, H), b2: (K,)  (PyTorch layout).

    Returns y: (B, K) float32 == sigmoid(relu(x @ w1.T + b1) @ w2.T + b2).
    """
    B, J = x.shape
    H = w1.shape[0]
    K = w2.shape[0]
    out_dtype = jnp.float32

    if B <= _SMALL_B:
        # Small batch: no grid at all -> no pipeline prologue/epilogue, one
        # fused kernel with every operand whole-array resident in VMEM.
        vmem = pl.BlockSpec(memory_space=pltpu.MemorySpace.VMEM)
        return pl.pallas_call(
            pnn_kernel_small,
            out_shape=jax.ShapeDtypeStruct((B, K), out_dtype),
            in_specs=[vmem, vmem, vmem, vmem, vmem],
            out_specs=vmem,
        )(x, w1, b1.reshape(1, H), w2, b2.reshape(1, K))

    # Large batch: lane-dense transposed formulation, batch tiled on the grid.
    tile = _pick_tile(B)
    n_tiles = pl.cdiv(B, tile)
    b_pad = n_tiles * tile
    xt = x.T                                   # (J, B): one-time layout change
    if b_pad != B:
        # Ragged batch: pad to a tile multiple (padded columns sliced off below)
        # instead of falling back to the gridless whole-array-in-VMEM path.
        xt = jnp.pad(xt, ((0, 0), (0, b_pad - B)))

    yt = pl.pallas_call(
        pnn_kernel_lanedense,
        out_shape=jax.ShapeDtypeStruct((K, b_pad), out_dtype),
        grid=(n_tiles,),
        in_specs=[
            pl.BlockSpec((J, tile), lambda i: (0, i)),   # x^T: lane-dense in B
            pl.BlockSpec((H, J), lambda i: (0, 0)),      # weights/biases stay
            pl.BlockSpec((H, 1), lambda i: (0, 0)),      # VMEM-resident across
            pl.BlockSpec((K, H), lambda i: (0, 0)),      # grid steps (constant
            pl.BlockSpec((K, 1), lambda i: (0, 0)),      # index_maps)
        ],
        out_specs=pl.BlockSpec((K, tile), lambda i: (0, i)),  # lane-dense stores
        compiler_params=pltpu.CompilerParams(
            dimension_semantics=("parallel",)),          # megacore split on v7x
    )(xt, w1, b1.reshape(H, 1), w2, b2.reshape(K, 1))

    return yt[:, :B].T                                   # back to (B, K)


def _torch_linear_init(key, out_features, in_features):
    """Deterministic stand-in for PyTorch nn.Linear default init:
    U(-1/sqrt(fan_in), 1/sqrt(fan_in)) for both weight and bias."""
    kw, kb = jax.random.split(key)
    bound = 1.0 / jnp.sqrt(jnp.float32(in_features))
    w = jax.random.uniform(kw, (out_features, in_features), jnp.float32,
                           minval=-bound, maxval=bound)
    b = jax.random.uniform(kb, (out_features,), jnp.float32,
                           minval=-bound, maxval=bound)
    return w, b


if __name__ == "__main__":
    key = jax.random.PRNGKey(0)
    k_x, k_l1, k_l2, k_big = jax.random.split(key, 4)

    # Q-matrix shape drives the network dims: J items x K skills.
    J, K = 16, 4                       # q: (16, 4)
    K_STAR = 2 ** K - 1 - K            # interaction-only polynomial features of q
    H = K + K_STAR                     # hidden width of l1 = 4 + 11 = 15
    B = 8                              # small batch of students

    x = jax.random.uniform(k_x, (B, J), jnp.float32)      # response vectors
    w1, b1 = _torch_linear_init(k_l1, H, J)               # l1: Linear(J -> H)
    w2, b2 = _torch_linear_init(k_l2, K, H)               # l2: Linear(H -> K)

    # Pure-JAX reference of the PyTorch forward.
    def ref_forward(xx):
        h = jnp.maximum(xx @ w1.T + b1, 0.0)
        return jax.nn.sigmoid(h @ w2.T + b2)

    # --- small-batch (gridless) path ---
    y = pnn_forward(x, w1, b1, w2, b2)
    jax.block_until_ready(y)
    assert y.shape == (B, K)
    assert jnp.allclose(y, ref_forward(x), atol=2e-3, rtol=2e-3), "small-batch mismatch"

    # --- lane-dense ("parallel" grid) path, divisible B -> 2 grid steps ---
    B_big = 4096
    x_big = jax.random.uniform(k_big, (B_big, J), jnp.float32)
    y_big = pnn_forward(x_big, w1, b1, w2, b2)
    jax.block_until_ready(y_big)
    assert y_big.shape == (B_big, K)
    assert jnp.allclose(y_big, ref_forward(x_big), atol=2e-3, rtol=2e-3), "tiled mismatch"

    # --- lane-dense path, ragged B (padded edge tile, sliced back) ---
    B_odd = 3000
    x_odd = x_big[:B_odd]
    y_odd = pnn_forward(x_odd, w1, b1, w2, b2)
    jax.block_until_ready(y_odd)
    assert y_odd.shape == (B_odd, K)
    assert jnp.allclose(y_odd, ref_forward(x_odd), atol=2e-3, rtol=2e-3), "ragged mismatch"

    print("KERNEL_OK")
</pallas_src>

<mosaic_0001>
module attributes {stable_mosaic.version = 11 : i64} {
  func.func @pnn_kernel_small(%arg0: memref<8x16xf32, #tpu.memory_space<vmem>>, %arg1: memref<15x16xf32, #tpu.memory_space<vmem>>, %arg2: memref<1x15xf32, #tpu.memory_space<vmem>>, %arg3: memref<4x15xf32, #tpu.memory_space<vmem>>, %arg4: memref<1x4xf32, #tpu.memory_space<vmem>>, %arg5: memref<8x4xf32, #tpu.memory_space<vmem>>) attributes {dimension_semantics = [], scalar_prefetch = 0 : i64, scratch_operands = 0 : i64, tpu.core_type = #tpu.core_type<tc>} {
    %c0 = arith.constant 0 : index
    %c0_0 = arith.constant 0 : index
    %0 = vector.load %arg0[%c0, %c0_0] : memref<8x16xf32, #tpu.memory_space<vmem>>, vector<8x16xf32>
    %c0_1 = arith.constant 0 : index
    %c0_2 = arith.constant 0 : index
    %1 = vector.load %arg1[%c0_1, %c0_2] : memref<15x16xf32, #tpu.memory_space<vmem>>, vector<15x16xf32>
    %cst = arith.constant dense<0.000000e+00> : vector<8x15xf32>
    %2 = tpu.matmul %0, %1, %cst {dimension_numbers = #tpu.dot_dimension_numbers<[1], [1], [0], [0], [0, 0, 1, 0], [], []>} : vector<8x16xf32>, vector<15x16xf32>, vector<8x15xf32> -> vector<8x15xf32>
    %c0_3 = arith.constant 0 : index
    %c0_4 = arith.constant 0 : index
    %3 = vector.load %arg2[%c0_3, %c0_4] : memref<1x15xf32, #tpu.memory_space<vmem>>, vector<1x15xf32>
    %4 = vector.broadcast %3 : vector<1x15xf32> to vector<8x15xf32>
    %5 = arith.addf %2, %4 : vector<8x15xf32>
    %cst_5 = arith.constant 0.000000e+00 : f32
    %6 = vector.broadcast %cst_5 : f32 to vector<8x15xf32>
    %7 = arith.maximumf %5, %6 : vector<8x15xf32>
    %c0_6 = arith.constant 0 : index
    %c0_7 = arith.constant 0 : index
    %8 = vector.load %arg3[%c0_6, %c0_7] : memref<4x15xf32, #tpu.memory_space<vmem>>, vector<4x15xf32>
    %cst_8 = arith.constant dense<0.000000e+00> : vector<8x4xf32>
    %9 = tpu.matmul %7, %8, %cst_8 {dimension_numbers = #tpu.dot_dimension_numbers<[1], [1], [0], [0], [0, 0, 1, 0], [], []>} : vector<8x15xf32>, vector<4x15xf32>, vector<8x4xf32> -> vector<8x4xf32>
    %c0_9 = arith.constant 0 : index
    %c0_10 = arith.constant 0 : index
    %10 = vector.load %arg4[%c0_9, %c0_10] : memref<1x4xf32, #tpu.memory_space<vmem>>, vector<1x4xf32>
    %11 = vector.broadcast %10 : vector<1x4xf32> to vector<8x4xf32>
    %12 = arith.addf %9, %11 : vector<8x4xf32>
    %cst_11 = arith.constant 5.000000e-01 : f32
    %13 = vector.broadcast %cst_11 : f32 to vector<8x4xf32>
    %14 = arith.mulf %13, %12 : vector<8x4xf32>
    %15 = math.tanh %14 : vector<8x4xf32>
    %cst_12 = arith.constant 5.000000e-01 : f32
    %16 = vector.broadcast %cst_12 : f32 to vector<8x4xf32>
    %17 = arith.mulf %16, %15 : vector<8x4xf32>
    %cst_13 = arith.constant 5.000000e-01 : f32
    %18 = vector.broadcast %cst_13 : f32 to vector<8x4xf32>
    %19 = arith.addf %17, %18 : vector<8x4xf32>
    %c0_14 = arith.constant 0 : index
    %c0_15 = arith.constant 0 : index
    %20 = vector.load %arg5[%c0_14, %c0_15] : memref<8x4xf32, #tpu.memory_space<vmem>>, vector<8x4xf32>
    tpu.vector_store %arg5[%c0_14, %c0_15], %19 {strides = array<i32>} : memref<8x4xf32, #tpu.memory_space<vmem>>, vector<8x4xf32>,
    return
  }
}

</mosaic_0001>

<bundles_post_ra>
// kernel: pnn_forward.1
= control target key start
LH: loop header
LB: loop body
LE: loop exit
PB: predicated region body
PF: predicated region fallthrough
CT: control target
= control target key end

     0   :  { %10 = vsyncpa [#allocation3], 0  ;;  %s399_s0 = inlined_call_operand.hbm [shape: f32[8,16], index: 0, kind: input, shape index: {}]   ;;  %s400_s1 = inlined_call_operand.hbm [shape: f32[15,16], index: 1, kind: input, shape index: {}]   ;;  %s401_s2 = inlined_call_operand.vmem [shape: f32[1,15], index: 2, kind: input, shape index: {}]   ;;  %s402_s3 = inlined_call_operand.vmem [shape: f32[4,15], index: 3, kind: input, shape index: {}]   ;;  %s403_s4 = inlined_call_operand.vmem [shape: f32[1,4], index: 4, kind: input, shape index: {}]   ;;  %s404_s5 = inlined_call_operand.vmem [shape: f32[8,4], index: 5, kind: output, shape index: {}]  }
   0x1   :  { %11 = vsyncpa [#allocation5], 0  ;;  %s319_s18 = smov [#allocation2]   ;;  %s320_s20 = smov [#allocation4]  }
   0x2   :  { %s18_s19 = sshll.u32 %s319_s18, 4  ;;  %s27_s21 = sshll.u32 %s320_s20, 4  ;;  %s19_s19 = int_to_ptr.vmem [resolvable:$true] %s18_s19  ;;  %s356_s21 = int_to_ptr.vmem [resolvable:$true] %s27_s21 }
   0x3   :  { %s271_s24 = scalar_lea.hbm %s399_s0, 128 }
   0x4   :  { %p272_p0 = scmp.ne.s32.totalorder %s399_s0, %s271_s24  ;;  %p275_p1 = scmp.lt.u32.totalorder %s271_s24, %s399_s0 }
   0x6   :  { %p277_p2 = pnand %p275_p1, %p272_p0 }
   0x8   :  { %280 = shalt.err (!%p277_p2)
}
   0x9   :  { %s281_s29 = scalar_lea.vmem %s19_s19, 128  ;;  %p286_p4 = scmp.lt.s32.totalorder %s19_s19, %s19_s19 }
   0xa   :  { %p282_p3 = scmp.ne.s32.totalorder %s19_s19, %s281_s29  ;;  %p287_p5 = scmp.lt.s32.totalorder %s281_s29, %s281_s29 }
   0xc   :  { %p288_p6 = por %p287_p5, %p286_p4 }
   0xe   :  { %p289_p7 = pnand %p288_p6, %p282_p3 }
  0x10   :  { %292 = shalt.err (!%p289_p7)
}
  0x11   :  { %21 = dma.hbm_to_vmem [thread:$0]  %s399_s0, 128, %s19_s19, [#allocation3]  }
  0x12   :  { %s293_s9 = scalar_lea.hbm %s400_s1, 256 }
  0x13   :  { %p294_p8 = scmp.ne.s32.totalorder %s400_s1, %s293_s9  ;;  %p297_p9 = scmp.lt.u32.totalorder %s293_s9, %s400_s1 }
  0x15   :  { %p299_p10 = pnand %p297_p9, %p294_p8 }
  0x17   :  { %302 = shalt.err (!%p299_p10)
}
  0x18   :  { %s303_s14 = scalar_lea.vmem %s356_s21, 256  ;;  %p308_p12 = scmp.lt.s32.totalorder %s356_s21, %s356_s21 }
  0x19   :  { %p304_p11 = scmp.ne.s32.totalorder %s356_s21, %s303_s14  ;;  %p309_p13 = scmp.lt.s32.totalorder %s303_s14, %s303_s14 }
  0x1b   :  { %p310_p0 = por %p309_p13, %p308_p12 }
  0x1d   :  { %p311_p1 = pnand %p310_p0, %p304_p11 }
  0x1f   :  { %314 = shalt.err (!%p311_p1)
}
  0x20   :  { %s321_s0 = smov 128   ;;  %s322_s15 = smov 8  }
  0x21   :  { %33 = dma.hbm_to_vmem [thread:$0]  %s400_s1, 256, %s356_s21, [#allocation5], %s321_s0, %s321_s0, %s322_s15  }
  0x22   :  { %315 = dma.done.wait [#allocation3], 128  }
  0x23   :  { %316 = vsyncadd [#allocation3], 4294967168 }
  0x24   :  { %317 = dma.done.wait [#allocation5], 256  }
  0x25   :  { %318 = vsyncadd [#allocation5], 4294967040  ;;  %v323_v0 = vmov 0.0|0.0   ;;  %vm324_vm0 = vmmov 0   ;;  %v325_v1 = vmov 0.0   ;;  %vm56_vm1 = vcmask 130048  }
  0x26   :  { %258 = vmatprep.subr.bf16.mxu0 %v323_v0  ;;  %250 = vmatprep.mubr.msk.f32.mxu0 %vm324_vm0, %v325_v1  ;;  %v47_v2 = vld [vmem:[#allocation4] sm:$0xff]  ;;  %v48_v3 = vld [vmem:[#allocation4 + $0x8] sm:$0x7f]  ;;  %vm260_vm2 = vmpackc.low %vm56_vm1, %vm56_vm1  ;;  %vm145_vm3 = vcmask 121856   ;;  %vm226_vm4 = vcmask 31744  }
  0x27   :  { %253 = vmatprep.subr.mxu1 %v325_v1  ;;  %255 = vmatprep.mubr.msk.f32.mxu1 %vm324_vm0, %v325_v1  ;;  %v259_v4 = vpack.c.bf16 %v48_v3, %v47_v2  ;;  %v46_v5 = vld [vmem:[#allocation2] sm:$0xff] }
  0x28   :  { %v137_v6 = vld [vmem:[%s402_s3] sm:$0xf] }
  0x29   :  { %261 = vmatpush3.bf16.xpose.msk.msra.mxu0 %vm260_vm2, %v259_v4  ;;  %254 = vmatpush3.xpose.msk.msra.mxu1 %vm145_vm3, %v137_v6  ;;  %v234_v7 = vld [vmem:[%s401_s2] ss:$0 sm:$0xff] }
  0x2a   :  { %v238_v12 = vld [vmem:[%s403_s4] ss:$0 sm:$0xff] }
  0x30   :  { %251 = vmatmul.mubr.msk.f32.vlgmr.msra.gmra.mrb[0].mxu0 %vm56_vm1, %v46_v5 }
 0x103   :  { %v132_v8 = vpop.f32.mrb[0].mxu0 }
 0x104   :  { %v133_v9 = vadd.f32 %v234_v7, %v132_v8  ;;  %v252_v10 = vpop.f32.mrb[1].mxu0 }
 0x106   :  { %v136_v11 = vmax.f32 %v133_v9, 0.0 }
 0x108   :  { %256 = vmatmul.mubr.msk.f32.vlgmr.msra.gmra.mrb[0].mxu1 %vm145_vm3, %v136_v11 }
 0x1db   :  { %v218_v13 = vpop.f32.mrb[0].mxu1 }
 0x1dc   :  { %v219_v14 = vadd.f32 %v238_v12, %v218_v13  ;;  %v257_v15 = vpop.f32.mrb[1].mxu1 }
 0x1de   :  { %v222_v16 = vmul.f32 0.5, %v219_v14 }
 0x1e0   :  { %269 = vtanh.f32 %v222_v16 }
 0x1ea   :  { %v270_v17 = vpop.eup %269 }
 0x1eb   :  { %v224_v18 = vmul.f32 0.5, %v270_v17 }
 0x1ed   :  { %v225_v19 = vadd.f32 0.5, %v224_v18 }
 0x1ef   :  { %227 = vst.msk [vmem:[%s404_s5] sm:$0xff] %vm226_vm4, %v225_v19 }
 0x1f0   :  { %232 = vsyncpa [#allocation3], 1 }
 0x1f1   :  { %233 = vsyncpa [#allocation5], 1 }

</bundles_post_ra>
